<compile_context>
chip_gen: v5e
topology: v5e:2x2
jax: 0.10.0
libtpu: 0.0.40
codegen_flags: <defaults>
</compile_context>

<pallas_src>
import functools

import jax
import jax.numpy as jnp
from jax import lax
from jax.experimental import pallas as pl
from jax.experimental.pallas import tpu as pltpu


def _svdd_l2_loss_kernel(x_ref, out_ref, acc_ref, *, radius, batch_size, tile_b):
    # x_ref:   (tile_b, N) native dtype in VMEM (one batch tile per grid step)
    # out_ref: (1, 1) f32 in SMEM (untiled; written once on the last step)
    # acc_ref: (tile_b, 1) f32 VMEM accumulator (persists across the grid)
    i = pl.program_id(0)

    @pl.when(i == 0)
    def _():
        acc_ref[...] = jnp.zeros_like(acc_ref)

    # Cast inside the kernel (VPU) — the wrapper does NOT pre-cast to f32,
    # halving HBM traffic for bf16 inputs.
    x = x_ref[...].astype(jnp.float32)
    x = jnp.maximum(x, 1e-8)                        # torch.clamp(min=1e-8)

    sq = jnp.sum(x * x, axis=1, keepdims=True)      # (tile_b, 1) f32

    # Rows past the true batch size (partial last tile) hold unspecified data;
    # neutralize them BEFORE the sqrt so no Inf/NaN is ever produced, then
    # mask their contribution out of the accumulator.
    row = i * tile_b + lax.broadcasted_iota(jnp.int32, (tile_b, 1), 0)
    valid = row < batch_size
    sq = jnp.where(valid, sq, 1.0)

    l1 = jnp.sqrt(sq)                               # EUP slot, otherwise idle
    # Fused per-row contribution to sum(l1) + sum(relu(l1 - radius)).
    t = l1 + jnp.maximum(l1 - radius, 0.0)
    acc_ref[...] += jnp.where(valid, t, 0.0)        # pure VPU in steady state

    @pl.when(i == pl.num_programs(0) - 1)
    def _():
        # mean(l2) + mean(l1) == (sum(l2) + sum(l1)) / B — one XLU reduce total.
        out_ref[0, 0] = jnp.sum(acc_ref[...]) / jnp.float32(batch_size)


def _tpu_vmem_capacity_bytes():
    try:
        return int(pltpu.get_tpu_info().vmem_capacity_bytes)
    except Exception:
        return 64 << 20          # conservative fallback: v7x per-TensorCore VMEM


def _pick_tile_b(b, n, itemsize, per_buffer_budget):
    """Batch-tile rows: dtype-native sublane multiple, <= B, within budget."""
    sub = max(8, 32 // max(1, itemsize))            # 8 f32 / 16 bf16 / 32 int8
    row_bytes = max(1, n * itemsize)
    budget_rows = (per_buffer_budget // row_bytes) // sub * sub
    if budget_rows < sub:
        # Even one sublane group of rows exceeds the per-buffer budget (huge
        # N); fall back to the smallest legal tile and let vmem_limit stretch.
        # TODO(synk): add an inner "arbitrary" grid axis over N (per-row
        # partial-sq accumulator) for N so large that `sub` rows exceed VMEM.
        return b if b <= sub else sub
    if b <= sub:
        return b                                    # full batch dim: legal block
    return int(min(budget_rows, (b // sub) * sub))


def svdd_l2_distance_loss(x, radius, *, tile_b=None):
    """Pallas implementation of SVDD_L2DistanceLoss.forward.

    x: (batch_size, n_shapelets) float array (any float dtype; cast in-kernel)
    radius: python float (self.radius), baked in as a compile-time constant
    returns: scalar f32 loss
    """
    assert x.ndim == 2
    b, n = x.shape
    itemsize = x.dtype.itemsize

    vmem_cap = _tpu_vmem_capacity_bytes()
    # ~16 MiB/buffer on 128-MiB parts (v5e/v6e), ~12 MiB/buffer on v7x (64 MiB).
    per_buffer_budget = min(16 << 20, max(4 << 20, vmem_cap // 5))
    if tile_b is None:
        tile_b = _pick_tile_b(b, n, itemsize, per_buffer_budget)
    grid = (pl.cdiv(b, tile_b),)

    # VMEM actually needed: 2 double-buffered input tiles + tiny accumulator;
    # set the limit explicitly from the real tile and keep physical headroom.
    tile_bytes = tile_b * n * itemsize
    vmem_limit = int(min(max(2 * tile_bytes + (4 << 20), 8 << 20),
                         max(8 << 20, vmem_cap - (8 << 20))))

    # NOTE: for n_shapelets < 128 the HBM tiled layout is lane-padded, so the
    # DMA streams padded bytes; folding rows into lanes only pays off if the
    # producer of `x` can emit a lane-dense layout (a wrapper-side reshape
    # would itself re-stream the array), so it is intentionally not done here.

    kernel = functools.partial(_svdd_l2_loss_kernel, radius=float(radius),
                               batch_size=b, tile_b=tile_b)

    out = pl.pallas_call(
        kernel,
        out_shape=jax.ShapeDtypeStruct((1, 1), jnp.float32),
        grid=grid,
        in_specs=[pl.BlockSpec((tile_b, n), lambda i: (i, 0))],   # batch tile
        out_specs=pl.BlockSpec(memory_space=pltpu.SMEM),          # scalar loss
        scratch_shapes=[pltpu.VMEM((tile_b, 1), jnp.float32)],    # row accum
        compiler_params=pltpu.CompilerParams(
            dimension_semantics=("arbitrary",),     # carries the accumulator
            vmem_limit_bytes=vmem_limit),
        cost_estimate=pl.CostEstimate(
            flops=3 * b * n, transcendentals=b,
            bytes_accessed=b * n * itemsize + 4),
    )(x)
    return out[0, 0]


def _reference_loss(x, radius):
    # Pure-JAX reference mirroring the PyTorch module.
    x = jnp.maximum(x.astype(jnp.float32), 1e-8)
    l1 = jnp.linalg.norm(x, axis=1)
    l2 = jnp.maximum(l1 - radius, 0.0)
    return jnp.mean(l2) + jnp.mean(l1)


if __name__ == "__main__":
    key = jax.random.PRNGKey(0)
    radius = 0.5                      # deterministic module parameter

    # Case 1: module-shaped f32 input (batch_size, n_shapelets).
    x1 = jax.random.normal(key, (8, 32), dtype=jnp.float32)
    loss1 = jax.block_until_ready(svdd_l2_distance_loss(x1, radius))
    ref1 = jax.block_until_ready(_reference_loss(x1, radius))
    assert jnp.allclose(loss1, ref1, rtol=1e-5, atol=1e-5), (loss1, ref1)

    # Case 2: bf16 input, ragged batch (exercises the in-kernel cast and the
    # full-batch-dim tile path).
    x2 = jax.random.normal(jax.random.PRNGKey(1), (13, 40),
                           dtype=jnp.float32).astype(jnp.bfloat16)
    loss2 = jax.block_until_ready(svdd_l2_distance_loss(x2, radius))
    ref2 = jax.block_until_ready(_reference_loss(x2, radius))
    assert jnp.allclose(loss2, ref2, rtol=1e-4, atol=1e-4), (loss2, ref2)

    # Case 3: forced small tile -> multi-step grid accumulation + masked
    # partial last tile (rows 20..23 of the 3rd tile are padding).
    x3 = jax.random.normal(jax.random.PRNGKey(2), (20, 40), dtype=jnp.float32)
    loss3 = jax.block_until_ready(svdd_l2_distance_loss(x3, radius, tile_b=8))
    ref3 = jax.block_until_ready(_reference_loss(x3, radius))
    assert jnp.allclose(loss3, ref3, rtol=1e-5, atol=1e-5), (loss3, ref3)

    print("KERNEL_OK")
</pallas_src>

<mosaic_0001>
module attributes {stable_mosaic.version = 11 : i64} {
  func.func @_svdd_l2_loss_kernel(%arg0: i32, %arg1: memref<8x32xf32, #tpu.memory_space<vmem>>, %arg2: memref<1x1xf32, #tpu.memory_space<smem>>, %arg3: memref<8x1xf32, #tpu.memory_space<vmem>>) attributes {dimension_semantics = [#tpu.dimension_semantics<arbitrary>], iteration_bounds = array<i64: 1>, scalar_prefetch = 0 : i64, scratch_operands = 1 : i64, tpu.core_type = #tpu.core_type<tc>, window_params = [{transform_indices = @transform_0, window_bounds = array<i64: 8, 32>}, {transform_indices = @transform_1, window_bounds = array<i64: 1, 1>}]} {
    %c0_i32 = arith.constant 0 : i32
    %0 = arith.cmpi eq, %arg0, %c0_i32 : i32
    %1 = arith.extui %0 : i1 to i32
    %c0_i32_0 = arith.constant 0 : i32
    %2 = arith.cmpi ne, %1, %c0_i32_0 : i32
    scf.if %2 {
      %cst_14 = arith.constant 0.000000e+00 : f32
      %31 = vector.broadcast %cst_14 : f32 to vector<8x1xf32>
      %c0_15 = arith.constant 0 : index
      %c0_16 = arith.constant 0 : index
      %32 = vector.load %arg3[%c0_15, %c0_16] : memref<8x1xf32, #tpu.memory_space<vmem>>, vector<8x1xf32>
      tpu.vector_store %arg3[%c0_15, %c0_16], %31 {strides = array<i32>} : memref<8x1xf32, #tpu.memory_space<vmem>>, vector<8x1xf32>,
    } else {
    }
    %c0 = arith.constant 0 : index
    %c0_1 = arith.constant 0 : index
    %3 = vector.load %arg1[%c0, %c0_1] : memref<8x32xf32, #tpu.memory_space<vmem>>, vector<8x32xf32>
    %cst = arith.constant 9.99999993E-9 : f32
    %4 = vector.broadcast %cst : f32 to vector<8x32xf32>
    %5 = arith.maximumf %3, %4 : vector<8x32xf32>
    %6 = arith.mulf %5, %5 : vector<8x32xf32>
    %cst_2 = arith.constant dense<0.000000e+00> : vector<8xf32>
    %7 = vector.multi_reduction <add>, %6, %cst_2 [1] : vector<8x32xf32> to vector<8xf32>
    %8 = vector.shape_cast %7 : vector<8xf32> to vector<8x1xf32>
    %c8_i32 = arith.constant 8 : i32
    %9 = arith.muli %arg0, %c8_i32 : i32
    %10 = tpu.iota {dimensions = array<i32: 0>} : vector<8x1xi32>
    %11 = vector.broadcast %9 : i32 to vector<8x1xi32>
    %12 = arith.addi %11, %10 : vector<8x1xi32>
    %c8_i32_3 = arith.constant 8 : i32
    %13 = vector.broadcast %c8_i32_3 : i32 to vector<8x1xi32>
    %14 = arith.cmpi slt, %12, %13 : vector<8x1xi32>
    %cst_4 = arith.constant 1.000000e+00 : f32
    %15 = vector.broadcast %cst_4 : f32 to vector<8x1xf32>
    %16 = arith.select %14, %8, %15 : vector<8x1xi1>, vector<8x1xf32>
    %17 = math.sqrt %16 : vector<8x1xf32>
    %cst_5 = arith.constant 5.000000e-01 : f32
    %18 = vector.broadcast %cst_5 : f32 to vector<8x1xf32>
    %19 = arith.subf %17, %18 : vector<8x1xf32>
    %cst_6 = arith.constant 0.000000e+00 : f32
    %20 = vector.broadcast %cst_6 : f32 to vector<8x1xf32>
    %21 = arith.maximumf %19, %20 : vector<8x1xf32>
    %22 = arith.addf %17, %21 : vector<8x1xf32>
    %c0_7 = arith.constant 0 : index
    %c0_8 = arith.constant 0 : index
    %23 = vector.load %arg3[%c0_7, %c0_8] : memref<8x1xf32, #tpu.memory_space<vmem>>, vector<8x1xf32>
    %cst_9 = arith.constant 0.000000e+00 : f32
    %24 = vector.broadcast %cst_9 : f32 to vector<8x1xf32>
    %25 = arith.select %14, %22, %24 : vector<8x1xi1>, vector<8x1xf32>
    %26 = arith.addf %23, %25 : vector<8x1xf32>
    %c0_10 = arith.constant 0 : index
    %c0_11 = arith.constant 0 : index
    %27 = vector.load %arg3[%c0_10, %c0_11] : memref<8x1xf32, #tpu.memory_space<vmem>>, vector<8x1xf32>
    tpu.vector_store %arg3[%c0_10, %c0_11], %26 {strides = array<i32>} : memref<8x1xf32, #tpu.memory_space<vmem>>, vector<8x1xf32>,
    %c0_i32_12 = arith.constant 0 : i32
    %28 = arith.cmpi eq, %arg0, %c0_i32_12 : i32
    %29 = arith.extui %28 : i1 to i32
    %c0_i32_13 = arith.constant 0 : i32
    %30 = arith.cmpi ne, %29, %c0_i32_13 : i32
    scf.if %30 {
      %c0_14 = arith.constant 0 : index
      %c0_15 = arith.constant 0 : index
      %31 = vector.load %arg3[%c0_14, %c0_15] : memref<8x1xf32, #tpu.memory_space<vmem>>, vector<8x1xf32>
      %32 = vector.shape_cast %31 : vector<8x1xf32> to vector<1x8x1xf32>
      %cst_16 = arith.constant dense<0.000000e+00> : vector<1xf32>
      %33 = vector.multi_reduction <add>, %32, %cst_16 [1, 2] : vector<1x8x1xf32> to vector<1xf32>
      %34 = vector.shape_cast %33 : vector<1xf32> to vector<1x1x1xf32>
      %35 = vector.extract %34[0, 0, 0] : f32 from vector<1x1x1xf32>
      %cst_17 = arith.constant 8.000000e+00 : f32
      %36 = arith.divf %35, %cst_17 : f32
      %c0_18 = arith.constant 0 : index
      %c0_19 = arith.constant 0 : index
      %37 = memref.load %arg2[%c0_18, %c0_19] : memref<1x1xf32, #tpu.memory_space<smem>>
      memref.store %36, %arg2[%c0_18, %c0_19] : memref<1x1xf32, #tpu.memory_space<smem>>
    } else {
    }
    return
  }
  func.func @transform_0(%arg0: i32) -> (i32, i32) {
    %c0_i32 = arith.constant 0 : i32
    %c0_i32_0 = arith.constant 0 : i32
    return %arg0, %c0_i32 : i32, i32
  }
  func.func @transform_1(%arg0: i32) -> (i32, i32) {
    %c0_i32 = arith.constant 0 : i32
    %c0_i32_0 = arith.constant 0 : i32
    %c0_i32_1 = arith.constant 0 : i32
    return %c0_i32, %c0_i32_0 : i32, i32
  }
}

</mosaic_0001>

<bundles_post_ra>
// kernel: tpu_custom_call.1
= control target key start
LH: loop header
LB: loop body
LE: loop exit
PB: predicated region body
PF: predicated region fallthrough
CT: control target
= control target key end

     0   :  { %6 = vsyncpa [#allocation4], 0  ;;  %s180_s0 = inlined_call_operand.hbm [shape: f32[8,32], index: 0, kind: input, shape index: {}]   ;;  %s181_s1 = inlined_call_operand.hbm [shape: f32[1,1], index: 1, kind: output, shape index: {}]  }
   0x1   :  { %7 = vsyncpa [#allocation5], 0  ;;  %s13_s8 = sshll.u32 %s180_s0, 4  ;;  %s157_s9 = smov [#allocation3]   ;;  %s14_s8 = int_to_ptr.hbm [resolvable:$true] %s13_s8 }
   0x2   :  { %s15_s10 = sshll.u32 %s157_s9, 4  ;;  %s16_s10 = int_to_ptr.vmem [resolvable:$true] %s15_s10 }
   0x3   :  { %18 = dma.hbm_to_vmem [thread:$0]  %s14_s8, 128, %s16_s10, [#allocation4]  }
   0x4   :  { %153 = dma.done.wait [#allocation4], 128  }
   0x5   :  { %154 = vsyncadd [#allocation4], 4294967168  ;;  %v29_v0 = vld [vmem:[#allocation3] sm:$0xff]  ;;  %vm32_vm0 = vcmask 261120   ;;  %vm27_vm1 = vcmask 7168   ;;  %v158_v4 = vmov 0.0  }
   0x6   :  { %v30_v1 = vmax.f32 %v29_v0, 1e-08  ;;  %28 = vst.msk [vmem:[#allocation2] sm:$0xff] %vm27_vm1, %v158_v4  ;;  %v159_v23 = vmov 8.0   ;;  %s93_s12 = sshll.u32 %s181_s1, 4  ;;  %s160_s16 = smov [#allocation6]   ;;  %s94_s12 = int_to_ptr.hbm [resolvable:$true] %s93_s12 }
   0x8   :  { %v31_v2 = vmul.f32 %v30_v1, %v30_v1 }
   0xa   :  { %v33_v3 = vsel %vm32_vm0, %v31_v2, 0.0 }
   0xb   :  { %34 = vadd.xlane.f32.xlu0 %v33_v3 }
   0xd   :  { %v58_v18 = vld [vmem:[#allocation2] sm:$0xff] }
  0x7e   :  { %v35_v5 = vpop.xlane.xlu0 %34 }
  0x7f   :  { %113 = vrsqrt.f32 %v35_v5  ;;  %vm50_vm2 = vcmp.eq.f32.partialorder %v35_v5, inf  ;;  %v53_v13 = vand.u32 2147483648, %v35_v5  ;;  %vm52_vm3 = vcmp.eq.f32.partialorder %v35_v5, 0.0 }
  0x80   :  { %115 = vrcp.f32 %v159_v23 }
  0x85   :  { %v114_v6 = vpop.eup %113 }
  0x86   :  { %v44_v7 = vmul.f32 %v114_v6, %v35_v5  ;;  %v116_v24 = vpop.eup %115 }
  0x87   :  { %v78_v25 = vmul.f32 8.0, %v116_v24  ;;  %vm82_vm4 = vweird.f32 %v116_v24 }
  0x88   :  { %v45_v8 = vmul.f32 %v114_v6, %v44_v7 }
  0x89   :  { %v79_v26 = vsub.f32 1.0, %v78_v25 }
  0x8a   :  { %v46_v9 = vmul.f32 0.5, %v45_v8 }
  0x8b   :  { %v80_v30 = vmul.f32 %v116_v24, %v79_v26 }
  0x8c   :  { %v47_v10 = vsub.f32 1.5, %v46_v9 }
  0x8d   :  { %v81_v33 = vadd.f32 %v116_v24, %v80_v30 }
  0x8e   :  { %v48_v11 = vmul.f32 %v114_v6, %v47_v10 }
  0x8f   :  { %v83_v36 = vsel %vm82_vm4, %v116_v24, %v81_v33 }
  0x90   :  { %v49_v12 = vmul.f32 %v48_v11, %v35_v5 }
  0x92   :  { %v51_v14 = vsel %vm50_vm2, %v35_v5, %v49_v12 }
  0x93   :  { %v54_v15 = vsel %vm52_vm3, %v53_v13, %v51_v14 }
  0x94   :  { %v104_v16 = vadd.f32 -0.5, %v54_v15 }
  0x96   :  { %v56_v17 = vmax.f32 %v104_v16, 0.0 }
  0x98   :  { %v57_v19 = vadd.f32 %v56_v17, %v54_v15 }
  0x9a   :  { %v60_v20 = vadd.f32 %v58_v18, %v57_v19 }
  0x9c   :  { %62 = vst.msk [vmem:[#allocation2] sm:$0xff] %vm27_vm1, %v60_v20 }
  0xa3   :  { %v66_v21 = vld [vmem:[#allocation2] sm:$0xff] }
  0xa4   :  { %v67_v22 = vsel %vm27_vm1, %v66_v21, 0.0 }
  0xa5   :  { %68 = vadd.xlane.f32.xlu0 %v67_v22 }
 0x118   :  { %v69_v27 = vpop.xlane.xlu0 %68 }
 0x119   :  { %v70_v28 = vrot.slane %v69_v27, 4 }
 0x11b   :  { %v71_v29 = vadd.f32 %v70_v28, %v69_v27 }
 0x11d   :  { %v72_v31 = vrot.slane %v71_v29, 2 }
 0x11f   :  { %v73_v32 = vadd.f32 %v72_v31, %v71_v29 }
 0x121   :  { %v74_v34 = vrot.slane %v73_v32, 1 }
 0x123   :  { %v75_v35 = vadd.f32 %v74_v34, %v73_v32 }
 0x125   :  { %105 = vpush %v75_v35 }
 0x126   :  { %107 = vpush %v83_v36 }
 0x156   :  { %s106_s13 = spop %105 }
 0x157   :  { %s108_s14 = spop %107 }
 0x158   :  { %s85_s15 = smul.f32 %s108_s14, %s106_s13 }
 0x15a   :  { %87 = sst [smem:[#allocation6]] %s85_s15 }
 0x15b   :  { %96 = dma.smem_to_hbm %s160_s16, 16, %s94_s12, [#allocation5]  }
 0x15c   :  { %155 = dma.done.wait [#allocation5], 16  }
 0x15d   :  { %156 = vsyncadd [#allocation5], 4294967280 }
 0x15e   :  { %101 = sfence }
 0x15f   :  { %102 = vsyncpa [#allocation4], 1 }
 0x160   :  { %103 = vsyncpa [#allocation5], 1 }

</bundles_post_ra>
